<compile_context>
chip_gen: v5e
topology: v5e:2x2
jax: 0.10.0
libtpu: 0.0.40
codegen_flags: <defaults>
</compile_context>

<pallas_src>
import functools
import math

import jax
import jax.numpy as jnp
from jax.experimental import pallas as pl
from jax.experimental.pallas import tpu as pltpu


def _round_up(x, m):
    return (x + m - 1) // m * m


def _mlp_kernel(x_ref, w1_ref, b1_ref, w2_ref, b2_ref, wh_ref, bh_ref, out_ref):
    # x_ref holds int8 pixels shifted by -128; the /255 scale and +128 offset
    # are already folded into w1/b1, so we just cast and matmul.
    x = x_ref[...].astype(jnp.float32)
    h1 = jnp.dot(x, w1_ref[...], preferred_element_type=jnp.float32) + b1_ref[...]
    h1 = jnp.maximum(h1, 0.0)
    h2 = jnp.dot(h1, w2_ref[...], preferred_element_type=jnp.float32) + b2_ref[...]
    h2 = jnp.maximum(h2, 0.0)
    # Fused (policy | value | zero-pad) head -> one lane-dense (TB, NP) store.
    out_ref[...] = (
        jnp.dot(h2, wh_ref[...], preferred_element_type=jnp.float32) + bh_ref[...]
    )


def prepare_params(params, num_outputs):
    """One-time parameter transform (exact algebraic rewrite of the module).

    (x/255) @ W1 + b1 == (x - 128) @ (W1/255) + (b1 + (128/255)*sum(W1, axis=0))
    Policy/value heads are concatenated and zero-padded to a 128-lane width.
    """
    w1, b1, w2, b2, wp, bp, wv, bv = params
    w1s = (w1 * (1.0 / 255.0)).astype(jnp.float32)
    b1p = (b1 + (128.0 / 255.0) * jnp.sum(w1, axis=0, keepdims=True)).astype(jnp.float32)

    nh = num_outputs + 1
    NP = max(128, _round_up(nh, 128))
    wh = jnp.concatenate([wp, wv], axis=1)
    bh = jnp.concatenate([bp, bv], axis=1)
    wh = jnp.pad(wh, ((0, 0), (0, NP - nh))).astype(jnp.float32)
    bh = jnp.pad(bh, ((0, 0), (0, NP - nh))).astype(jnp.float32)
    return (w1s, b1p, w2.astype(jnp.float32), b2.astype(jnp.float32), wh, bh)


@functools.partial(jax.jit, static_argnames=("num_outputs",))
def simple_mlp_forward(obs, prepared, *, num_outputs):
    """Returns (policy_logits [B, num_outputs], value_out_flat [B])."""
    w1s, b1p, w2, b2, wh, bh = prepared
    B = obs.shape[0]
    D = w1s.shape[0]
    H1 = w1s.shape[1]       # 128
    H2 = w2.shape[1]        # 32
    NP = wh.shape[1]        # lane-padded fused head width (>=128)

    # Flatten and shift pixels to int8 (0..255 -> -128..127): 1 byte/elem of
    # HBM traffic instead of 4. The +128 offset is already folded into b1p.
    x_i8 = (obs.reshape(B, -1).astype(jnp.int32) - 128).astype(jnp.int8)

    # Batch tile: multiple of 32 (int8 sublane packing), capped at 512 rows.
    TB = min(512, _round_up(B, 32))
    B_pad = _round_up(B, TB)
    if B_pad != B:
        x_i8 = jnp.pad(x_i8, ((0, B_pad - B), (0, 0)))
    grid = (B_pad // TB,)

    flops = 2 * B_pad * (D * H1 + H1 * H2 + H2 * NP)
    bytes_accessed = (
        B_pad * D                                             # int8 input
        + 4 * (D * H1 + H1 + H1 * H2 + H2 + H2 * NP + NP)     # f32 params
        + 4 * B_pad * NP                                      # f32 output
    )

    out = pl.pallas_call(
        _mlp_kernel,
        out_shape=jax.ShapeDtypeStruct((B_pad, NP), jnp.float32),
        grid=grid,
        in_specs=[
            pl.BlockSpec((TB, D), lambda i: (i, 0)),    # x: tiled over batch
            pl.BlockSpec((D, H1), lambda i: (0, 0)),    # weights/biases resident
            pl.BlockSpec((1, H1), lambda i: (0, 0)),
            pl.BlockSpec((H1, H2), lambda i: (0, 0)),
            pl.BlockSpec((1, H2), lambda i: (0, 0)),
            pl.BlockSpec((H2, NP), lambda i: (0, 0)),
            pl.BlockSpec((1, NP), lambda i: (0, 0)),
        ],
        out_specs=pl.BlockSpec((TB, NP), lambda i: (i, 0)),
        compiler_params=pltpu.CompilerParams(
            dimension_semantics=("parallel",),
        ),
        cost_estimate=pl.CostEstimate(
            flops=flops, transcendentals=0, bytes_accessed=bytes_accessed),
    )(x_i8, w1s, b1p, w2, b2, wh, bh)

    policy = out[:B, :num_outputs]      # forward() return
    value = out[:B, num_outputs]        # value_function() return (flattened)
    return policy, value


def init_params(key, obs_dim, num_outputs):
    """Deterministic init mimicking torch.nn.Linear default (U(-1/sqrt(fan_in), +))."""
    def linear(key, fan_in, fan_out):
        kw, kb = jax.random.split(key)
        bound = 1.0 / math.sqrt(fan_in)
        w = jax.random.uniform(kw, (fan_in, fan_out), jnp.float32, -bound, bound)
        b = jax.random.uniform(kb, (1, fan_out), jnp.float32, -bound, bound)
        return w, b

    k1, k2, k3, k4 = jax.random.split(key, 4)
    w1, b1 = linear(k1, obs_dim, 128)
    w2, b2 = linear(k2, 128, 32)
    wp, bp = linear(k3, 32, num_outputs)
    wv, bv = linear(k4, 32, 1)
    return (w1, b1, w2, b2, wp, bp, wv, bv)


if __name__ == "__main__":
    # Small image-like obs space: B=2, C=4, H=W=16.
    B, C, H, W = 2, 4, 16, 16
    num_outputs = 8
    obs_dim = C * H * W

    key = jax.random.PRNGKey(0)
    k_obs, k_params = jax.random.split(key)

    # Synthetic uint8 observations in [0, 255].
    obs = jax.random.randint(k_obs, (B, C, H, W), 0, 256, dtype=jnp.int32).astype(
        jnp.uint8)

    params = init_params(k_params, obs_dim, num_outputs)
    prepared = prepare_params(params, num_outputs)

    policy, value = simple_mlp_forward(obs, prepared, num_outputs=num_outputs)
    jax.block_until_ready((policy, value))

    # Pure-JAX reference of the original module semantics.
    x = obs.astype(jnp.float32).reshape(B, -1) / 255.0
    w1, b1, w2, b2, wp, bp, wv, bv = params
    h1 = jnp.maximum(x @ w1 + b1, 0.0)
    h2 = jnp.maximum(h1 @ w2 + b2, 0.0)
    ref_policy = h2 @ wp + bp
    ref_value = (h2 @ wv + bv).reshape(-1)

    assert policy.shape == (B, num_outputs)
    assert value.shape == (B,)
    assert jnp.allclose(policy, ref_policy, atol=1e-3, rtol=1e-3)
    assert jnp.allclose(value, ref_value, atol=1e-3, rtol=1e-3)
    print("KERNEL_OK")
</pallas_src>

<mosaic_0001>
module attributes {stable_mosaic.version = 11 : i64} {
  func.func @_mlp_kernel(%arg0: i32, %arg1: memref<32x1024xi8, #tpu.memory_space<vmem>>, %arg2: memref<1024x128xf32, #tpu.memory_space<vmem>>, %arg3: memref<1x128xf32, #tpu.memory_space<vmem>>, %arg4: memref<128x32xf32, #tpu.memory_space<vmem>>, %arg5: memref<1x32xf32, #tpu.memory_space<vmem>>, %arg6: memref<32x128xf32, #tpu.memory_space<vmem>>, %arg7: memref<1x128xf32, #tpu.memory_space<vmem>>, %arg8: memref<32x128xf32, #tpu.memory_space<vmem>>) attributes {dimension_semantics = [#tpu.dimension_semantics<parallel>], iteration_bounds = array<i64: 1>, scalar_prefetch = 0 : i64, scratch_operands = 0 : i64, tpu.core_type = #tpu.core_type<tc>, window_params = [{transform_indices = @transform_0, window_bounds = array<i64: 32, 1024>}, {pipeline_mode = #tpu.pipeline_mode<synchronous>, transform_indices = @transform_1, window_bounds = array<i64: 1024, 128>}, {pipeline_mode = #tpu.pipeline_mode<synchronous>, transform_indices = @transform_2, window_bounds = array<i64: 1, 128>}, {pipeline_mode = #tpu.pipeline_mode<synchronous>, transform_indices = @transform_3, window_bounds = array<i64: 128, 32>}, {pipeline_mode = #tpu.pipeline_mode<synchronous>, transform_indices = @transform_4, window_bounds = array<i64: 1, 32>}, {pipeline_mode = #tpu.pipeline_mode<synchronous>, transform_indices = @transform_5, window_bounds = array<i64: 32, 128>}, {pipeline_mode = #tpu.pipeline_mode<synchronous>, transform_indices = @transform_6, window_bounds = array<i64: 1, 128>}, {transform_indices = @transform_7, window_bounds = array<i64: 32, 128>}]} {
    %c0 = arith.constant 0 : index
    %c0_0 = arith.constant 0 : index
    %0 = vector.load %arg1[%c0, %c0_0] : memref<32x1024xi8, #tpu.memory_space<vmem>>, vector<32x1024xi8>
    %1 = arith.sitofp %0 : vector<32x1024xi8> to vector<32x1024xf32>
    %c0_1 = arith.constant 0 : index
    %c0_2 = arith.constant 0 : index
    %2 = vector.load %arg2[%c0_1, %c0_2] : memref<1024x128xf32, #tpu.memory_space<vmem>>, vector<1024x128xf32>
    %cst = arith.constant dense<0.000000e+00> : vector<32x128xf32>
    %3 = tpu.matmul %1, %2, %cst {dimension_numbers = #tpu.dot_dimension_numbers<[1], [0], [0], [1], [0, 0, 1, 1], [], []>} : vector<32x1024xf32>, vector<1024x128xf32>, vector<32x128xf32> -> vector<32x128xf32>
    %c0_3 = arith.constant 0 : index
    %c0_4 = arith.constant 0 : index
    %4 = vector.load %arg3[%c0_3, %c0_4] : memref<1x128xf32, #tpu.memory_space<vmem>>, vector<1x128xf32>
    %5 = vector.broadcast %4 : vector<1x128xf32> to vector<32x128xf32>
    %6 = arith.addf %3, %5 : vector<32x128xf32>
    %cst_5 = arith.constant 0.000000e+00 : f32
    %7 = vector.broadcast %cst_5 : f32 to vector<32x128xf32>
    %8 = arith.maximumf %6, %7 : vector<32x128xf32>
    %c0_6 = arith.constant 0 : index
    %c0_7 = arith.constant 0 : index
    %9 = vector.load %arg4[%c0_6, %c0_7] : memref<128x32xf32, #tpu.memory_space<vmem>>, vector<128x32xf32>
    %cst_8 = arith.constant dense<0.000000e+00> : vector<32x32xf32>
    %10 = tpu.matmul %8, %9, %cst_8 {dimension_numbers = #tpu.dot_dimension_numbers<[1], [0], [0], [1], [0, 0, 1, 1], [], []>} : vector<32x128xf32>, vector<128x32xf32>, vector<32x32xf32> -> vector<32x32xf32>
    %c0_9 = arith.constant 0 : index
    %c0_10 = arith.constant 0 : index
    %11 = vector.load %arg5[%c0_9, %c0_10] : memref<1x32xf32, #tpu.memory_space<vmem>>, vector<1x32xf32>
    %12 = vector.broadcast %11 : vector<1x32xf32> to vector<32x32xf32>
    %13 = arith.addf %10, %12 : vector<32x32xf32>
    %cst_11 = arith.constant 0.000000e+00 : f32
    %14 = vector.broadcast %cst_11 : f32 to vector<32x32xf32>
    %15 = arith.maximumf %13, %14 : vector<32x32xf32>
    %c0_12 = arith.constant 0 : index
    %c0_13 = arith.constant 0 : index
    %16 = vector.load %arg6[%c0_12, %c0_13] : memref<32x128xf32, #tpu.memory_space<vmem>>, vector<32x128xf32>
    %cst_14 = arith.constant dense<0.000000e+00> : vector<32x128xf32>
    %17 = tpu.matmul %15, %16, %cst_14 {dimension_numbers = #tpu.dot_dimension_numbers<[1], [0], [0], [1], [0, 0, 1, 1], [], []>} : vector<32x32xf32>, vector<32x128xf32>, vector<32x128xf32> -> vector<32x128xf32>
    %c0_15 = arith.constant 0 : index
    %c0_16 = arith.constant 0 : index
    %18 = vector.load %arg7[%c0_15, %c0_16] : memref<1x128xf32, #tpu.memory_space<vmem>>, vector<1x128xf32>
    %19 = vector.broadcast %18 : vector<1x128xf32> to vector<32x128xf32>
    %20 = arith.addf %17, %19 : vector<32x128xf32>
    %c0_17 = arith.constant 0 : index
    %c0_18 = arith.constant 0 : index
    %21 = vector.load %arg8[%c0_17, %c0_18] : memref<32x128xf32, #tpu.memory_space<vmem>>, vector<32x128xf32>
    tpu.vector_store %arg8[%c0_17, %c0_18], %20 {strides = array<i32>} : memref<32x128xf32, #tpu.memory_space<vmem>>, vector<32x128xf32>,
    return
  }
  func.func @transform_0(%arg0: i32) -> (i32, i32) {
    %c0_i32 = arith.constant 0 : i32
    %c0_i32_0 = arith.constant 0 : i32
    return %arg0, %c0_i32 : i32, i32
  }
  func.func @transform_1(%arg0: i32) -> (i32, i32) {
    %c0_i32 = arith.constant 0 : i32
    %c0_i32_0 = arith.constant 0 : i32
    %c0_i32_1 = arith.constant 0 : i32
    return %c0_i32, %c0_i32_0 : i32, i32
  }
  func.func @transform_2(%arg0: i32) -> (i32, i32) {
    %c0_i32 = arith.constant 0 : i32
    %c0_i32_0 = arith.constant 0 : i32
    %c0_i32_1 = arith.constant 0 : i32
    return %c0_i32, %c0_i32_0 : i32, i32
  }
  func.func @transform_3(%arg0: i32) -> (i32, i32) {
    %c0_i32 = arith.constant 0 : i32
    %c0_i32_0 = arith.constant 0 : i32
    %c0_i32_1 = arith.constant 0 : i32
    return %c0_i32, %c0_i32_0 : i32, i32
  }
  func.func @transform_4(%arg0: i32) -> (i32, i32) {
    %c0_i32 = arith.constant 0 : i32
    %c0_i32_0 = arith.constant 0 : i32
    %c0_i32_1 = arith.constant 0 : i32
    return %c0_i32, %c0_i32_0 : i32, i32
  }
  func.func @transform_5(%arg0: i32) -> (i32, i32) {
    %c0_i32 = arith.constant 0 : i32
    %c0_i32_0 = arith.constant 0 : i32
    %c0_i32_1 = arith.constant 0 : i32
    return %c0_i32, %c0_i32_0 : i32, i32
  }
  func.func @transform_6(%arg0: i32) -> (i32, i32) {
    %c0_i32 = arith.constant 0 : i32
    %c0_i32_0 = arith.constant 0 : i32
    %c0_i32_1 = arith.constant 0 : i32
    return %c0_i32, %c0_i32_0 : i32, i32
  }
  func.func @transform_7(%arg0: i32) -> (i32, i32) {
    %c0_i32 = arith.constant 0 : i32
    %c0_i32_0 = arith.constant 0 : i32
    return %arg0, %c0_i32 : i32, i32
  }
}

</mosaic_0001>

<bundles_post_ra>
// kernel: simple_mlp_forward.1
= control target key start
LH: loop header
LB: loop body
LE: loop exit
PB: predicated region body
PF: predicated region fallthrough
CT: control target
= control target key end

     0   :  { %12 = vsyncpa [#allocation3], 0  ;;  %s650_s27 = smov [#allocation2]   ;;  %s651_s29 = smov 128   ;;  %s849_s0 = inlined_call_operand.vmem [shape: s8[32,1024], index: 0, kind: input, shape index: {}]   ;;  %s850_s1 = inlined_call_operand.hbm [shape: f32[1024,128], index: 1, kind: input, shape index: {}]   ;;  %s851_s2 = inlined_call_operand.vmem [shape: f32[1,128], index: 2, kind: input, shape index: {}]   ;;  %s852_s3 = inlined_call_operand.vmem [shape: f32[128,32], index: 3, kind: input, shape index: {}]   ;;  %s853_s4 = inlined_call_operand.vmem [shape: f32[1,32], index: 4, kind: input, shape index: {}]   ;;  %s854_s5 = inlined_call_operand.vmem [shape: f32[32,128], index: 5, kind: input, shape index: {}]   ;;  %s855_s6 = inlined_call_operand.vmem [shape: f32[1,128], index: 6, kind: input, shape index: {}]   ;;  %s856_s7 = inlined_call_operand.vmem [shape: f32[32,128], index: 7, kind: output, shape index: {}]  }
   0x1   :  { %s19_s26 = sshll.u32 %s850_s1, 4  ;;  %s21_s28 = sshll.u32 %s650_s27, 4  ;;  %s20_s26 = int_to_ptr.hbm [resolvable:$true] %s19_s26  ;;  %s22_s28 = int_to_ptr.vmem [resolvable:$true] %s21_s28 }
   0x2   :  { %s652_s30 = smov 8  }
   0x3   :  { %27 = dma.hbm_to_vmem [thread:$0]  %s20_s26, 16384, %s22_s28, [#allocation3], %s651_s29, %s651_s29, %s652_s30  }
   0x4   :  { %648 = dma.done.wait [#allocation3], 16384  }
   0x5   :  { %649 = vsyncadd [#allocation3], 4294950912  ;;  %v129_v0 = vld [vmem:[#allocation2 + $0x78] sm:$0xff]  ;;  %v128_v2 = vld [vmem:[#allocation2 + $0x70] sm:$0xff]  ;;  %vm543_vm0 = vcmask 261120  }
   0x6   :  { %v161_v1 = vld [vmem:[#allocation2 + $0x178] sm:$0xff]  ;;  %246 = vmatpush.msra.mxu0 %v129_v0  ;;  %v160_v4 = vld [vmem:[#allocation2 + $0x170] sm:$0xff]  ;;  %v127_v6 = vld [vmem:[#allocation2 + $0x68] sm:$0xff] }
   0x7   :  { %304 = vmatpush.msra.mxu2 %v161_v1  ;;  %v145_v3 = vld [vmem:[#allocation2 + $0xf8] sm:$0xff]  ;;  %v144_v7 = vld [vmem:[#allocation2 + $0xf0] sm:$0xff]  ;;  %v159_v8 = vld [vmem:[#allocation2 + $0x168] sm:$0xff] }
   0x8   :  { %v177_v5 = vld [vmem:[#allocation2 + $0x1f8] sm:$0xff]  ;;  %275 = vmatpush.msra.mxu1 %v145_v3  ;;  %247 = vmatpush.msra.mxu0 %v128_v2  ;;  %v176_v9 = vld [vmem:[#allocation2 + $0x1f0] sm:$0xff]  ;;  %v143_v10 = vld [vmem:[#allocation2 + $0xe8] sm:$0xff] }
   0x9   :  { %333 = vmatpush.msra.mxu3 %v177_v5  ;;  %305 = vmatpush.msra.mxu2 %v160_v4  ;;  %v126_v11 = vld [vmem:[#allocation2 + $0x60] sm:$0xff]  ;;  %v175_v13 = vld [vmem:[#allocation2 + $0x1e8] sm:$0xff]  ;;  %v125_v16 = vld [vmem:[#allocation2 + $0x58] sm:$0xff] }
   0xa   :  { %276 = vmatpush.msra.mxu1 %v144_v7  ;;  %v158_v12 = vld [vmem:[#allocation2 + $0x160] sm:$0xff]  ;;  %248 = vmatpush.msra.mxu0 %v127_v6  ;;  %v157_v17 = vld [vmem:[#allocation2 + $0x158] sm:$0xff]  ;;  %v124_v20 = vld [vmem:[#allocation2 + $0x50] sm:$0xff] }
   0xb   :  { %334 = vmatpush.msra.mxu3 %v176_v9  ;;  %306 = vmatpush.msra.mxu2 %v159_v8  ;;  %v142_v14 = vld [vmem:[#allocation2 + $0xe0] sm:$0xff]  ;;  %v141_v18 = vld [vmem:[#allocation2 + $0xd8] sm:$0xff]  ;;  %v156_v21 = vld [vmem:[#allocation2 + $0x150] sm:$0xff] }
   0xc   :  { %v174_v15 = vld [vmem:[#allocation2 + $0x1e0] sm:$0xff]  ;;  %277 = vmatpush.msra.mxu1 %v143_v10  ;;  %249 = vmatpush.msra.mxu0 %v126_v11  ;;  %v173_v19 = vld [vmem:[#allocation2 + $0x1d8] sm:$0xff]  ;;  %v140_v22 = vld [vmem:[#allocation2 + $0xd0] sm:$0xff] }
   0xd   :  { %335 = vmatpush.msra.mxu3 %v175_v13  ;;  %307 = vmatpush.msra.mxu2 %v158_v12  ;;  %v172_v23 = vld [vmem:[#allocation2 + $0x1d0] sm:$0xff]  ;;  %v123_v24 = vld [vmem:[#allocation2 + $0x48] sm:$0xff]  ;;  %v122_v28 = vld [vmem:[#allocation2 + $0x40] sm:$0xff] }
   0xe   :  { %278 = vmatpush.msra.mxu1 %v142_v14  ;;  %250 = vmatpush.msra.mxu0 %v125_v16  ;;  %v155_v25 = vld [vmem:[#allocation2 + $0x148] sm:$0xff]  ;;  %v154_v29 = vld [vmem:[#allocation2 + $0x140] sm:$0xff]  ;;  %v121_v32 = vld [vmem:[#allocation2 + $0x38] sm:$0xff] }
   0xf   :  { %336 = vmatpush.msra.mxu3 %v174_v15  ;;  %308 = vmatpush.msra.mxu2 %v157_v17  ;;  %v139_v26 = vld [vmem:[#allocation2 + $0xc8] sm:$0xff]  ;;  %v138_v30 = vld [vmem:[#allocation2 + $0xc0] sm:$0xff]  ;;  %v153_v33 = vld [vmem:[#allocation2 + $0x138] sm:$0xff] }
  0x10   :  { %279 = vmatpush.msra.mxu1 %v141_v18  ;;  %251 = vmatpush.msra.mxu0 %v124_v20  ;;  %v171_v27 = vld [vmem:[#allocation2 + $0x1c8] sm:$0xff]  ;;  %v170_v31 = vld [vmem:[#allocation2 + $0x1c0] sm:$0xff]  ;;  %v137_v34 = vld [vmem:[#allocation2 + $0xb8] sm:$0xff] }
  0x11   :  { %337 = vmatpush.msra.mxu3 %v173_v19  ;;  %309 = vmatpush.msra.mxu2 %v156_v21  ;;  %v169_v35 = vld [vmem:[#allocation2 + $0x1b8] sm:$0xff]  ;;  %v120_v36 = vld [vmem:[#allocation2 + $0x30] sm:$0xff]  ;;  %v119_v40 = vld [vmem:[#allocation2 + $0x28] sm:$0xff] }
  0x12   :  { %280 = vmatpush.msra.mxu1 %v140_v22  ;;  %252 = vmatpush.msra.mxu0 %v123_v24  ;;  %v152_v37 = vld [vmem:[#allocation2 + $0x130] sm:$0xff]  ;;  %v151_v41 = vld [vmem:[#allocation2 + $0x128] sm:$0xff]  ;;  %v118_v44 = vld [vmem:[#allocation2 + $0x20] sm:$0xff] }
  0x13   :  { %338 = vmatpush.msra.mxu3 %v172_v23  ;;  %310 = vmatpush.msra.mxu2 %v155_v25  ;;  %v136_v38 = vld [vmem:[#allocation2 + $0xb0] sm:$0xff]  ;;  %v135_v42 = vld [vmem:[#allocation2 + $0xa8] sm:$0xff]  ;;  %v150_v45 = vld [vmem:[#allocation2 + $0x120] sm:$0xff] }
  0x14   :  { %281 = vmatpush.msra.mxu1 %v139_v26  ;;  %253 = vmatpush.msra.mxu0 %v122_v28  ;;  %v168_v39 = vld [vmem:[#allocation2 + $0x1b0] sm:$0xff]  ;;  %v167_v43 = vld [vmem:[#allocation2 + $0x1a8] sm:$0xff]  ;;  %v134_v46 = vld [vmem:[#allocation2 + $0xa0] sm:$0xff] }
  0x15   :  { %339 = vmatpush.msra.mxu3 %v171_v27  ;;  %311 = vmatpush.msra.mxu2 %v154_v29  ;;  %v166_v47 = vld [vmem:[#allocation2 + $0x1a0] sm:$0xff]  ;;  %v704_v49 = vld [vmem:[%s849_s0 + $0x10] sm:$0xff]  ;;  %v117_v50 = vld [vmem:[#allocation2 + $0x18] sm:$0xff] }
  0x16   :  { %282 = vmatpush.msra.mxu1 %v138_v30  ;;  %254 = vmatpush.msra.mxu0 %v121_v32  ;;  %v699_v48 = vld [vmem:[%s849_s0] sm:$0xff]  ;;  %v149_v51 = vld [vmem:[#allocation2 + $0x118] sm:$0xff]  ;;  %v116_v52 = vld [vmem:[#allocation2 + $0x10] sm:$0xff]  ;;  %v52_v57 = vunpack.c.0.s8 %v704_v49  ;;  %v60_v19 = vunpack.c.1.s8 %v704_v49 }
  0x17   :  { %340 = vmatpush.msra.mxu3 %v170_v31  ;;  %312 = vmatpush.msra.mxu2 %v153_v33  ;;  %v133_v53 = vld [vmem:[#allocation2 + $0x98] sm:$0xff]  ;;  %v148_v55 = vld [vmem:[#allocation2 + $0x110] sm:$0xff]  ;;  %v50_v56 = vunpack.c.0.s8 %v699_v48  ;;  %v711_v58 = vld [vmem:[%s849_s0 + $0x8] sm:$0xff]  ;;  %v58_v18 = vunpack.c.1.s8 %v699_v48 }
  0x18   :  { %283 = vmatpush.msra.mxu1 %v137_v34  ;;  %255 = vmatpush.msra.mxu0 %v120_v36  ;;  %v165_v54 = vld [vmem:[#allocation2 + $0x198] sm:$0xff]  ;;  %v132_v60 = vld [vmem:[#allocation2 + $0x90] sm:$0xff]  ;;  %v115_v62 = vld [vmem:[#allocation2 + $0x8] sm:$0xff]  ;;  %v51_v2 = vunpack.c.0.s8 %v711_v58  ;;  %v84_v7 = vcvt.s32.f32 %v52_v57  ;;  %v59_v26 = vunpack.c.1.s8 %v711_v58  ;;  %v92_v31 = vcvt.s32.f32 %v60_v19 }
  0x19   :  { %341 = vmatpush.msra.mxu3 %v169_v35  ;;  %313 = vmatpush.msra.mxu2 %v152_v37  ;;  %v716_v59 = vld [vmem:[%s849_s0 + $0x18] sm:$0xff]  ;;  %v164_v61 = vld [vmem:[#allocation2 + $0x190] sm:$0xff]  ;;  %v147_v63 = vld [vmem:[#allocation2 + $0x108] sm:$0xff]  ;;  %v82_v6 = vcvt.s32.f32 %v50_v56  ;;  %v90_v30 = vcvt.s32.f32 %v58_v18 }
  0x1a   :  { %284 = vmatpush.msra.mxu1 %v136_v38  ;;  %256 = vmatpush.msra.mxu0 %v119_v40  ;;  %v131_v0 = vld [vmem:[#allocation2 + $0x88] sm:$0xff]  ;;  %v53_v3 = vunpack.c.0.s8 %v716_v59  ;;  %v114_v4 = vld [vmem:[#allocation2] sm:$0xff]  ;;  %v225_v8 = vld [vmem:[#allocation2 + $0x378] sm:$0xff]  ;;  %v83_v12 = vcvt.s32.f32 %v51_v2  ;;  %v61_v27 = vunpack.c.1.s8 %v716_v59  ;;  %v91_v36 = vcvt.s32.f32 %v59_v26 }
  0x1b   :  { %342 = vmatpush.msra.mxu3 %v168_v39  ;;  %314 = vmatpush.msra.mxu2 %v151_v41  ;;  %v163_v1 = vld [vmem:[#allocation2 + $0x188] sm:$0xff]  ;;  %v146_v5 = vld [vmem:[#allocation2 + $0x100] sm:$0xff]  ;;  %v193_v11 = vld [vmem:[#allocation2 + $0x278] sm:$0xff] }
  0x1c   :  { %285 = vmatpush.msra.mxu1 %v135_v42  ;;  %257 = vmatpush.msra.mxu0 %v118_v44  ;;  %v130_v9 = vld [vmem:[#allocation2 + $0x80] sm:$0xff]  ;;  %v85_v13 = vcvt.s32.f32 %v53_v3  ;;  %v224_v14 = vld [vmem:[#allocation2 + $0x370] sm:$0xff]  ;;  %v241_v15 = vld [vmem:[#allocation2 + $0x3f8] sm:$0xff]  ;;  %v93_v37 = vcvt.s32.f32 %v61_v27  ;;  %v68_v44 = vunpack.c.2.s8 %v704_v49 }
  0x1d   :  { %343 = vmatpush.msra.mxu3 %v167_v43  ;;  %315 = vmatpush.msra.mxu2 %v150_v45  ;;  %v162_v10 = vld [vmem:[#allocation2 + $0x180] sm:$0xff]  ;;  %v192_v16 = vld [vmem:[#allocation2 + $0x270] sm:$0xff]  ;;  %v209_v17 = vld [vmem:[#allocation2 + $0x2f8] sm:$0xff]  ;;  %v66_v43 = vunpack.c.2.s8 %v699_v48 }
  0x1e   :  { %286 = vmatpush.msra.mxu1 %v134_v46  ;;  %258 = vmatpush.msra.mxu0 %v117_v50  ;;  %v223_v20 = vld [vmem:[#allocation2 + $0x368] sm:$0xff]  ;;  %v240_v21 = vld [vmem:[#allocation2 + $0x3f0] sm:$0xff]  ;;  %v222_v24 = vld [vmem:[#allocation2 + $0x360] sm:$0xff]  ;;  %v100_v57 = vcvt.s32.f32 %v68_v44 }
  0x1f   :  { %344 = vmatpush.msra.mxu3 %v166_v47  ;;  %316 = vmatpush.msra.mxu2 %v149_v51  ;;  %v191_v22 = vld [vmem:[#allocation2 + $0x268] sm:$0xff]  ;;  %v208_v23 = vld [vmem:[#allocation2 + $0x2f0] sm:$0xff]  ;;  %v190_v28 = vld [vmem:[#allocation2 + $0x260] sm:$0xff]  ;;  %v98_v56 = vcvt.s32.f32 %v66_v43 }
  0x20   :  { %287 = vmatpush.msra.mxu1 %v133_v53  ;;  %259 = vmatpush.msra.mxu0 %v116_v52  ;;  %v239_v25 = vld [vmem:[#allocation2 + $0x3e8] sm:$0xff]  ;;  %v221_v32 = vld [vmem:[#allocation2 + $0x358] sm:$0xff]  ;;  %v238_v33 = vld [vmem:[#allocation2 + $0x3e0] sm:$0xff]  ;;  %v67_v52 = vunpack.c.2.s8 %v711_v58  ;;  %v69_v53 = vunpack.c.2.s8 %v716_v59 }
  0x21   :  { %345 = vmatpush.msra.mxu3 %v165_v54  ;;  %317 = vmatpush.msra.mxu2 %v148_v55  ;;  %v207_v29 = vld [vmem:[#allocation2 + $0x2e8] sm:$0xff]  ;;  %v189_v34 = vld [vmem:[#allocation2 + $0x258] sm:$0xff]  ;;  %v206_v35 = vld [vmem:[#allocation2 + $0x2e0] sm:$0xff] }
  0x22   :  { %288 = vmatpush.msra.mxu1 %v132_v60  ;;  %260 = vmatpush.msra.mxu0 %v115_v62  ;;  %v220_v38 = vld [vmem:[#allocation2 + $0x350] sm:$0xff]  ;;  %v237_v39 = vld [vmem:[#allocation2 + $0x3d8] sm:$0xff]  ;;  %v219_v42 = vld [vmem:[#allocation2 + $0x348] sm:$0xff] }
  0x23   :  { %346 = vmatpush.msra.mxu3 %v164_v61  ;;  %318 = vmatpush.msra.mxu2 %v147_v63  ;;  %v188_v40 = vld [vmem:[#allocation2 + $0x250] sm:$0xff]  ;;  %v205_v41 = vld [vmem:[#allocation2 + $0x2d8] sm:$0xff]  ;;  %v187_v46 = vld [vmem:[#allocation2 + $0x248] sm:$0xff] }
  0x24   :  { %289 = vmatpush.msra.mxu1 %v131_v0  ;;  %261 = vmatpush.msra.mxu0 %v114_v4  ;;  %v236_v45 = vld [vmem:[#allocation2 + $0x3d0] sm:$0xff]  ;;  %v218_v50 = vld [vmem:[#allocation2 + $0x340] sm:$0xff]  ;;  %v235_v51 = vld [vmem:[#allocation2 + $0x3c8] sm:$0xff]  ;;  %v99_v0 = vcvt.s32.f32 %v67_v52 }
  0x25   :  { %347 = vmatpush.msra.mxu3 %v163_v1  ;;  %319 = vmatpush.msra.mxu2 %v146_v5  ;;  %v204_v47 = vld [vmem:[#allocation2 + $0x2d0] sm:$0xff]  ;;  %v186_v54 = vld [vmem:[#allocation2 + $0x240] sm:$0xff]  ;;  %v203_v55 = vld [vmem:[#allocation2 + $0x2c8] sm:$0xff]  ;;  %v101_v1 = vcvt.s32.f32 %v69_v53 }
  0x26   :  { %262 = vmatmul.f32.vlgmr.msra.gmra.mxu0 %v82_v6  ;;  %320 = vmatmul.f32.vlgmr.msra.gmra.mxu2 %v84_v7  ;;  %v217_v60 = vld [vmem:[#allocation2 + $0x338] sm:$0xff]  ;;  %v234_v61 = vld [vmem:[#allocation2 + $0x3c0] sm:$0xff]  ;;  %v216_v2 = vld [vmem:[#allocation2 + $0x330] sm:$0xff]  ;;  %v74_v6 = vunpack.c.3.s8 %v699_v48  ;;  %v76_v7 = vunpack.c.3.s8 %v704_v49 }
  0x27   :  { %420 = vmatpush.msrb.mxu2 %v225_v8  ;;  %290 = vmatpush.msra.mxu1 %v130_v9  ;;  %v185_v62 = vld [vmem:[#allocation2 + $0x238] sm:$0xff]  ;;  %v202_v63 = vld [vmem:[#allocation2 + $0x2c0] sm:$0xff]  ;;  %v184_v4 = vld [vmem:[#allocation2 + $0x230] sm:$0xff] }
  0x28   :  { %348 = vmatpush.msra.mxu3 %v162_v10  ;;  %362 = vmatpush.msrb.mxu0 %v193_v11  ;;  %v233_v3 = vld [vmem:[#allocation2 + $0x3b8] sm:$0xff]  ;;  %v215_v8 = vld [vmem:[#allocation2 + $0x328] sm:$0xff]  ;;  %v232_v9 = vld [vmem:[#allocation2 + $0x3b0] sm:$0xff] }
  0x29   :  { %291 = vmatmul.f32.vlgmr.msra.gmra.mxu1 %v83_v12  ;;  %349 = vmatmul.f32.vlgmr.msra.gmra.mxu3 %v85_v13  ;;  %v201_v5 = vld [vmem:[#allocation2 + $0x2b8] sm:$0xff]  ;;  %v183_v10 = vld [vmem:[#allocation2 + $0x228] sm:$0xff]  ;;  %v200_v11 = vld [vmem:[#allocation2 + $0x2b0] sm:$0xff] }
  0x2a   :  { %421 = vmatpush.msrb.mxu2 %v224_v14  ;;  %449 = vmatpush.msrb.mxu3 %v241_v15  ;;  %v214_v12 = vld [vmem:[#allocation2 + $0x320] sm:$0xff]  ;;  %v231_v13 = vld [vmem:[#allocation2 + $0x3a8] sm:$0xff]  ;;  %v75_v14 = vunpack.c.3.s8 %v711_v58  ;;  %v77_v15 = vunpack.c.3.s8 %v716_v59  ;;  %v213_v18 = vld [vmem:[#allocation2 + $0x318] sm:$0xff] }
  0x2b   :  { %363 = vmatpush.msrb.mxu0 %v192_v16  ;;  %391 = vmatpush.msrb.mxu1 %v209_v17  ;;  %v182_v48 = vld [vmem:[#allocation2 + $0x220] sm:$0xff]  ;;  %v199_v49 = vld [vmem:[#allocation2 + $0x2a8] sm:$0xff]  ;;  %v106_v16 = vcvt.s32.f32 %v74_v6  ;;  %v108_v17 = vcvt.s32.f32 %v76_v7  ;;  %v750_v27 = vld [vmem:[%s849_s0 + $0x38] sm:$0xff] }
  0x2c   :  { %422 = vmatpush.msrb.mxu2 %v223_v20  ;;  %450 = vmatpush.msrb.mxu3 %v240_v21  ;;  %v230_v19 = vld [vmem:[#allocation2 + $0x3a0] sm:$0xff]  ;;  %v181_v20 = vld [vmem:[#allocation2 + $0x218] sm:$0xff]  ;;  %v109_v58 = vcvt.s32.f32 %v77_v15  ;;  %v745_v26 = vld [vmem:[%s849_s0 + $0x28] sm:$0xff]  ;;  %v65_v53 = vunpack.c.1.s8 %v750_v27  ;;  %v81_v7 = vunpack.c.3.s8 %v750_v27 }
  0x2d   :  { %364 = vmatpush.msrb.mxu0 %v191_v22  ;;  %392 = vmatpush.msrb.mxu1 %v208_v23  ;;  %v198_v21 = vld [vmem:[#allocation2 + $0x2a0] sm:$0xff]  ;;  %v107_v22 = vcvt.s32.f32 %v75_v14  ;;  %v740_v23 = vld [vmem:[%s849_s0 + $0x30] sm:$0xff]  ;;  %v63_v52 = vunpack.c.1.s8 %v745_v26  ;;  %v79_v6 = vunpack.c.3.s8 %v745_v26  ;;  %v495_v14 = vld [vmem:[%s852_s3 + $0x68] sm:$0xff] }
  0x2e   :  { %423 = vmatpush.msrb.mxu2 %v222_v24  ;;  %451 = vmatpush.msrb.mxu3 %v239_v25  ;;  %v735_v59 = vld [vmem:[%s849_s0 + $0x20] sm:$0xff]  ;;  %v212_v24 = vld [vmem:[#allocation2 + $0x310] sm:$0xff]  ;;  %v229_v25 = vld [vmem:[#allocation2 + $0x398] sm:$0xff] }
  0x2f   :  { %365 = vmatpush.msrb.mxu0 %v190_v28  ;;  %393 = vmatpush.msrb.mxu1 %v207_v29  ;;  %v180_v28 = vld [vmem:[#allocation2 + $0x210] sm:$0xff]  ;;  %v197_v29 = vld [vmem:[#allocation2 + $0x298] sm:$0xff]  ;;  %v226_v44 = vld [vmem:[#allocation2 + $0x380] sm:$0xff] }
  0x30   :  { %265 = vmatmul.f32.gmra.mxu0 %v90_v30  ;;  %323 = vmatmul.f32.gmra.mxu2 %v92_v31  ;;  %v54_v30 = vunpack.c.0.s8 %v735_v59  ;;  %v56_v31 = vunpack.c.0.s8 %v740_v23  ;;  %v494_v15 = vld [vmem:[%s852_s3 + $0x60] sm:$0xff] }
  0x31   :  { %424 = vmatpush.msrb.mxu2 %v221_v32  ;;  %452 = vmatpush.msrb.mxu3 %v238_v33  ;;  %v211_v32 = vld [vmem:[#allocation2 + $0x308] sm:$0xff]  ;;  %v228_v33 = vld [vmem:[#allocation2 + $0x390] sm:$0xff] }
  0x32   :  { %366 = vmatpush.msrb.mxu0 %v189_v34  ;;  %394 = vmatpush.msrb.mxu1 %v206_v35  ;;  %v179_v34 = vld [vmem:[#allocation2 + $0x208] sm:$0xff]  ;;  %v196_v35 = vld [vmem:[#allocation2 + $0x290] sm:$0xff]  ;;  %v88_v43 = vcvt.s32.f32 %v56_v31  ;;  %v482_v31 = vld [vmem:[%s852_s3] sm:$0xff] }
  0x33   :  { %294 = vmatmul.f32.gmra.mxu1 %v91_v36  ;;  %352 = vmatmul.f32.gmra.mxu3 %v93_v37  ;;  %v55_v36 = vunpack.c.0.s8 %v745_v26  ;;  %v57_v37 = vunpack.c.0.s8 %v750_v27 }
  0x34   :  { %425 = vmatpush.msrb.mxu2 %v220_v38  ;;  %453 = vmatpush.msrb.mxu3 %v237_v39  ;;  %v210_v38 = vld [vmem:[#allocation2 + $0x300] sm:$0xff]  ;;  %v227_v39 = vld [vmem:[#allocation2 + $0x388] sm:$0xff] }
  0x35   :  { %367 = vmatpush.msrb.mxu0 %v188_v40  ;;  %395 = vmatpush.msrb.mxu1 %v205_v41  ;;  %v178_v40 = vld [vmem:[#allocation2 + $0x200] sm:$0xff]  ;;  %v195_v41 = vld [vmem:[#allocation2 + $0x288] sm:$0xff] }
  0x36   :  { %426 = vmatpush.msrb.mxu2 %v219_v42  ;;  %454 = vmatpush.msrb.mxu3 %v236_v45  ;;  %v86_v42 = vcvt.s32.f32 %v54_v30  ;;  %v194_v45 = vld [vmem:[#allocation2 + $0x280] sm:$0xff] }
  0x37   :  { %368 = vmatpush.msrb.mxu0 %v187_v46  ;;  %396 = vmatpush.msrb.mxu1 %v204_v47  ;;  %v87_v46 = vcvt.s32.f32 %v55_v36  ;;  %v89_v47 = vcvt.s32.f32 %v57_v37 }
  0x38   :  { %427 = vmatpush.msrb.mxu2 %v218_v50  ;;  %455 = vmatpush.msrb.mxu3 %v235_v51  ;;  %v62_v50 = vunpack.c.1.s8 %v735_v59  ;;  %v64_v51 = vunpack.c.1.s8 %v740_v23 }
  0x39   :  { %369 = vmatpush.msrb.mxu0 %v186_v54  ;;  %397 = vmatpush.msrb.mxu1 %v203_v55 }
  0x3a   :  { %268 = vmatmul.f32.gmra.mxu0 %v98_v56  ;;  %326 = vmatmul.f32.gmra.mxu2 %v100_v57  ;;  %v94_v54 = vcvt.s32.f32 %v62_v50  ;;  %v96_v55 = vcvt.s32.f32 %v64_v51  ;;  %v95_v56 = vcvt.s32.f32 %v63_v52  ;;  %v97_v57 = vcvt.s32.f32 %v65_v53 }
  0x3b   :  { %428 = vmatpush.msrb.mxu2 %v217_v60  ;;  %456 = vmatpush.msrb.mxu3 %v234_v61  ;;  %v70_v60 = vunpack.c.2.s8 %v735_v59  ;;  %v72_v61 = vunpack.c.2.s8 %v740_v23 }
  0x3c   :  { %370 = vmatpush.msrb.mxu0 %v185_v62  ;;  %398 = vmatpush.msrb.mxu1 %v202_v63  ;;  %v71_v62 = vunpack.c.2.s8 %v745_v26  ;;  %v73_v63 = vunpack.c.2.s8 %v750_v27  ;;  %v485_v26 = vld [vmem:[%s852_s3 + $0x18] sm:$0xff]  ;;  %v484_v27 = vld [vmem:[%s852_s3 + $0x10] sm:$0xff] }
  0x3d   :  { %297 = vmatmul.f32.gmra.mxu1 %v99_v0  ;;  %355 = vmatmul.f32.gmra.mxu3 %v101_v1  ;;  %v102_v0 = vcvt.s32.f32 %v70_v60  ;;  %v104_v1 = vcvt.s32.f32 %v72_v61 }
  0x3e   :  { %429 = vmatpush.msrb.mxu2 %v216_v2  ;;  %457 = vmatpush.msrb.mxu3 %v233_v3  ;;  %v103_v2 = vcvt.s32.f32 %v71_v62  ;;  %v105_v3 = vcvt.s32.f32 %v73_v63 }
  0x3f   :  { %371 = vmatpush.msrb.mxu0 %v184_v4  ;;  %399 = vmatpush.msrb.mxu1 %v201_v5  ;;  %v78_v4 = vunpack.c.3.s8 %v735_v59  ;;  %v80_v5 = vunpack.c.3.s8 %v740_v23  ;;  %v487_v59 = vld [vmem:[%s852_s3 + $0x28] sm:$0xff] }
  0x40   :  { %430 = vmatpush.msrb.mxu2 %v215_v8  ;;  %458 = vmatpush.msrb.mxu3 %v232_v9 }
  0x41   :  { %372 = vmatpush.msrb.mxu0 %v183_v10  ;;  %400 = vmatpush.msrb.mxu1 %v200_v11  ;;  %v110_v8 = vcvt.s32.f32 %v78_v4  ;;  %v112_v9 = vcvt.s32.f32 %v80_v5  ;;  %v111_v10 = vcvt.s32.f32 %v79_v6  ;;  %v113_v11 = vcvt.s32.f32 %v81_v7 }
  0x42   :  { %431 = vmatpush.msrb.mxu2 %v214_v12  ;;  %459 = vmatpush.msrb.mxu3 %v231_v13  ;;  %v497_v12 = vld [vmem:[%s852_s3 + $0x78] sm:$0xff]  ;;  %v496_v13 = vld [vmem:[%s852_s3 + $0x70] sm:$0xff] }
  0x43   :  { %373 = vmatpush.msrb.mxu0 %v182_v48  ;;  %401 = vmatpush.msrb.mxu1 %v199_v49  ;;  %v493_v48 = vld [vmem:[%s852_s3 + $0x58] sm:$0xff]  ;;  %v492_v49 = vld [vmem:[%s852_s3 + $0x50] sm:$0xff] }
  0x44   :  { %271 = vmatmul.f32.gmra.mxu0 %v106_v16  ;;  %329 = vmatmul.f32.gmra.mxu2 %v108_v17  ;;  %v491_v17 = vld [vmem:[%s852_s3 + $0x48] sm:$0xff] }
  0x45   :  { %432 = vmatpush.msrb.mxu2 %v213_v18  ;;  %460 = vmatpush.msrb.mxu3 %v230_v19  ;;  %v490_v18 = vld [vmem:[%s852_s3 + $0x40] sm:$0xff] }
  0x46   :  { %374 = vmatpush.msrb.mxu0 %v181_v20  ;;  %402 = vmatpush.msrb.mxu1 %v198_v21  ;;  %v489_v20 = vld [vmem:[%s852_s3 + $0x38] sm:$0xff] }
  0x47   :  { %300 = vmatmul.f32.gmra.mxu1 %v107_v22  ;;  %358 = vmatmul.f32.gmra.mxu3 %v109_v58  ;;  %v488_v22 = vld [vmem:[%s852_s3 + $0x30] sm:$0xff] }
  0x48   :  { %433 = vmatpush.msrb.mxu2 %v212_v24  ;;  %461 = vmatpush.msrb.mxu3 %v229_v25  ;;  %v486_v24 = vld [vmem:[%s852_s3 + $0x20] sm:$0xff] }
  0x49   :  { %375 = vmatpush.msrb.mxu0 %v180_v28  ;;  %403 = vmatpush.msrb.mxu1 %v197_v29  ;;  %v483_v29 = vld [vmem:[%s852_s3 + $0x8] sm:$0xff] }
  0x4a   :  { %434 = vmatpush.msrb.mxu2 %v211_v32  ;;  %462 = vmatpush.msrb.mxu3 %v228_v33  ;;  %v621_v33 = vld [vmem:[%s851_s2] ss:$0 sm:$0xff] }
  0x4b   :  { %376 = vmatpush.msrb.mxu0 %v179_v34  ;;  %404 = vmatpush.msrb.mxu1 %v196_v35 }
  0x4c   :  { %435 = vmatpush.msrb.mxu2 %v210_v38  ;;  %463 = vmatpush.msrb.mxu3 %v227_v39 }
  0x4d   :  { %377 = vmatpush.msrb.mxu0 %v178_v40  ;;  %405 = vmatpush.msrb.mxu1 %v195_v41 }
  0x4e   :  { %378 = vmatmul.f32.vlgmr.msrb.gmra.mxu0 %v86_v42  ;;  %436 = vmatmul.f32.vlgmr.msrb.gmra.mxu2 %v88_v43 }
  0x4f   :  { %464 = vmatpush.msrb.mxu3 %v226_v44  ;;  %406 = vmatpush.msrb.mxu1 %v194_v45 }
  0x50   :  { %407 = vmatmul.f32.vlgmr.msrb.gmra.mxu1 %v87_v46  ;;  %465 = vmatmul.f32.vlgmr.msrb.gmra.mxu3 %v89_v47 }
  0x51   :  { %502 = vmatpush.msra.mxu0 %v497_v12  ;;  %598 = vmatpush.msra.mxu2 %v497_v12 }
  0x53   :  { %503 = vmatpush.msra.mxu0 %v496_v13  ;;  %599 = vmatpush.msra.mxu2 %v496_v13 }
  0x55   :  { %504 = vmatpush.msra.mxu0 %v495_v14  ;;  %600 = vmatpush.msra.mxu2 %v495_v14 }
  0x56   :  { %381 = vmatmul.f32.gmra.mxu0 %v94_v54  ;;  %439 = vmatmul.f32.gmra.mxu2 %v96_v55  ;;  %v538_v55 = vld [vmem:[%s854_s5 + $0x18] sm:$0xff] }
  0x57   :  { %505 = vmatpush.msra.mxu0 %v494_v15  ;;  %601 = vmatpush.msra.mxu2 %v494_v15 }
  0x58   :  { %410 = vmatmul.f32.gmra.mxu1 %v95_v56  ;;  %468 = vmatmul.f32.gmra.mxu3 %v97_v57 }
  0x59   :  { %506 = vmatpush.msra.mxu0 %v493_v48  ;;  %602 = vmatpush.msra.mxu2 %v493_v48 }
  0x5a   :  { %614 = vmatpush.msra.mxu3 %v538_v55  ;;  %568 = vmatpush.msra.mxu1 %v538_v55 }
  0x5b   :  { %507 = vmatpush.msra.mxu0 %v492_v49  ;;  %603 = vmatpush.msra.mxu2 %v492_v49 }
  0x5d   :  { %508 = vmatpush.msra.mxu0 %v491_v17  ;;  %604 = vmatpush.msra.mxu2 %v491_v17 }
  0x5e   :  { %384 = vmatmul.f32.gmra.mxu0 %v102_v0  ;;  %442 = vmatmul.f32.gmra.mxu2 %v104_v1 }
  0x5f   :  { %509 = vmatpush.msra.mxu0 %v490_v18  ;;  %605 = vmatpush.msra.mxu2 %v490_v18 }
  0x60   :  { %413 = vmatmul.f32.gmra.mxu1 %v103_v2  ;;  %471 = vmatmul.f32.gmra.mxu3 %v105_v3 }
  0x61   :  { %510 = vmatpush.msra.mxu0 %v489_v20  ;;  %606 = vmatpush.msra.mxu2 %v489_v20 }
  0x63   :  { %511 = vmatpush.msra.mxu0 %v488_v22  ;;  %607 = vmatpush.msra.mxu2 %v488_v22 }
  0x65   :  { %512 = vmatpush.msra.mxu0 %v487_v59  ;;  %608 = vmatpush.msra.mxu2 %v487_v59 }
  0x66   :  { %387 = vmatmul.f32.gmra.mxu0 %v110_v8  ;;  %445 = vmatmul.f32.gmra.mxu2 %v112_v9 }
  0x67   :  { %513 = vmatpush.msra.mxu0 %v486_v24  ;;  %609 = vmatpush.msra.mxu2 %v486_v24 }
  0x68   :  { %416 = vmatmul.f32.gmra.mxu1 %v111_v10  ;;  %474 = vmatmul.f32.gmra.mxu3 %v113_v11 }
  0x69   :  { %514 = vmatpush.msra.mxu0 %v485_v26  ;;  %610 = vmatpush.msra.mxu2 %v485_v26 }
  0x6b   :  { %515 = vmatpush.msra.mxu0 %v484_v27  ;;  %611 = vmatpush.msra.mxu2 %v484_v27 }
  0x6d   :  { %516 = vmatpush.msra.mxu0 %v483_v29  ;;  %612 = vmatpush.msra.mxu2 %v483_v29 }
  0x6f   :  { %517 = vmatpush.msra.mxu0 %v482_v31  ;;  %613 = vmatpush.msra.mxu2 %v482_v31  ;;  %v536_v31 = vld [vmem:[%s854_s5 + $0x8] sm:$0xff] }
  0xa3   :  { %v263_v16 = vpop.f32.mrf.mxu0 }
  0xa4   :  { %v264_v36 = vadd.f32 %v621_v33, %v263_v16 }
  0xa6   :  { %v292_v19 = vpop.f32.mrf.mxu1 }
  0xa7   :  { %v293_v39 = vadd.f32 %v292_v19, %v264_v36 }
  0xa9   :  { %v321_v21 = vpop.f32.mrf.mxu2 }
  0xaa   :  { %v322_v41 = vadd.f32 %v321_v21, %v293_v39 }
  0xac   :  { %v350_v58 = vpop.f32.mrf.mxu3 }
  0xad   :  { %v266_v23 = vpop.f32.mrf.mxu0  ;;  %v351_v44 = vadd.f32 %v350_v58, %v322_v41 }
  0xae   :  { %v267_v42 = vadd.f32 %v621_v33, %v266_v23 }
  0xb0   :  { %v295_v25 = vpop.f32.mrf.mxu1 }
  0xb1   :  { %v296_v45 = vadd.f32 %v295_v25, %v267_v42 }
  0xb3   :  { %v324_v28 = vpop.f32.mrf.mxu2 }
  0xb4   :  { %v325_v52 = vadd.f32 %v324_v28, %v296_v45 }
  0xb6   :  { %v353_v30 = vpop.f32.mrf.mxu3 }
  0xb7   :  { %v269_v32 = vpop.f32.mrf.mxu0  ;;  %v354_v57 = vadd.f32 %v353_v30, %v325_v52  ;;  %v537_v30 = vld [vmem:[%s854_s5 + $0x10] sm:$0xff] }
  0xb8   :  { %v270_v53 = vadd.f32 %v621_v33, %v269_v32  ;;  %569 = vmatpush.msra.mxu1 %v537_v30  ;;  %615 = vmatpush.msra.mxu3 %v537_v30  ;;  %v535_v32 = vld [vmem:[%s854_s5] sm:$0xff] }
  0xba   :  { %v298_v34 = vpop.f32.mrf.mxu1  ;;  %570 = vmatpush.msra.mxu1 %v536_v31  ;;  %616 = vmatpush.msra.mxu3 %v536_v31 }
  0xbb   :  { %v299_v60 = vadd.f32 %v298_v34, %v270_v53 }
  0xbc   :  { %571 = vmatpush.msra.mxu1 %v535_v32  ;;  %617 = vmatpush.msra.mxu3 %v535_v32 }
  0xbd   :  { %v327_v35 = vpop.f32.mrf.mxu2 }
  0xbe   :  { %v328_v3 = vadd.f32 %v327_v35, %v299_v60 }
  0xc0   :  { %v356_v37 = vpop.f32.mrf.mxu3 }
  0xc1   :  { %v272_v38 = vpop.f32.mrf.mxu0  ;;  %v357_v8 = vadd.f32 %v356_v37, %v328_v3 }
  0xc2   :  { %v273_v4 = vadd.f32 %v621_v33, %v272_v38  ;;  %v622_v33 = vld [vmem:[%s853_s4] ss:$0 sm:$0xff] }
  0xc4   :  { %v301_v40 = vpop.f32.mrf.mxu1 }
  0xc5   :  { %v302_v9 = vadd.f32 %v301_v40, %v273_v4 }
  0xc7   :  { %v330_v43 = vpop.f32.mrf.mxu2 }
  0xc8   :  { %v331_v48 = vadd.f32 %v330_v43, %v302_v9 }
  0xca   :  { %v359_v46 = vpop.f32.mrf.mxu3 }
  0xcb   :  { %v379_v47 = vpop.f32.mrf.mxu0  ;;  %v360_v18 = vadd.f32 %v359_v46, %v331_v48  ;;  %v623_v46 = vld [vmem:[%s855_s6] ss:$0 sm:$0xff] }
  0xcc   :  { %v380_v50 = vadd.f32 %v379_v47, %v351_v44 }
  0xcd   :  { %v408_v51 = vpop.f32.mrf.mxu1 }
  0xce   :  { %v409_v54 = vadd.f32 %v408_v51, %v380_v50 }
  0xd1   :  { %v437_v56 = vpop.f32.mrf.mxu2 }
  0xd2   :  { %v438_v61 = vadd.f32 %v437_v56, %v409_v54 }
  0xd3   :  { %v382_v62 = vpop.f32.mrf.mxu0  ;;  %v466_v63 = vpop.f32.mrf.mxu3 }
  0xd4   :  { %v383_v0 = vadd.f32 %v382_v62, %v354_v57  ;;  %v467_v1 = vadd.f32 %v466_v63, %v438_v61 }
  0xd5   :  { %v411_v2 = vpop.f32.mrf.mxu1 }
  0xd6   :  { %v478_v5 = vmax.f32 %v467_v1, 0.0  ;;  %v412_v6 = vadd.f32 %v411_v2, %v383_v0 }
  0xd8   :  { %518 = vmatmul.f32.vlgmr.msra.gmra.mxu0 %v478_v5 }
  0xd9   :  { %v440_v7 = vpop.f32.mrf.mxu2 }
  0xda   :  { %v441_v10 = vadd.f32 %v440_v7, %v412_v6 }
  0xdb   :  { %v385_v11 = vpop.f32.mrf.mxu0  ;;  %v469_v12 = vpop.f32.mrf.mxu3 }
  0xdc   :  { %v386_v13 = vadd.f32 %v385_v11, %v357_v8  ;;  %v470_v14 = vadd.f32 %v469_v12, %v441_v10 }
  0xdd   :  { %v414_v15 = vpop.f32.mrf.mxu1 }
  0xde   :  { %v479_v49 = vmax.f32 %v470_v14, 0.0  ;;  %v415_v16 = vadd.f32 %v414_v15, %v386_v13 }
  0xe0   :  { %521 = vmatmul.f32.gmra.mxu0 %v479_v49 }
  0xe1   :  { %v443_v17 = vpop.f32.mrf.mxu2 }
  0xe2   :  { %v444_v19 = vadd.f32 %v443_v17, %v415_v16 }
  0xe3   :  { %v388_v20 = vpop.f32.mrf.mxu0  ;;  %v472_v21 = vpop.f32.mrf.mxu3 }
  0xe4   :  { %v389_v22 = vadd.f32 %v388_v20, %v360_v18  ;;  %v473_v58 = vadd.f32 %v472_v21, %v444_v19 }
  0xe5   :  { %v417_v59 = vpop.f32.mrf.mxu1 }
  0xe6   :  { %v480_v23 = vmax.f32 %v473_v58, 0.0  ;;  %v418_v24 = vadd.f32 %v417_v59, %v389_v22 }
  0xe8   :  { %524 = vmatmul.f32.vlgmr.msra.gmra.mxu2 %v480_v23 }
  0xe9   :  { %v446_v25 = vpop.f32.mrf.mxu2 }
  0xea   :  { %v447_v26 = vadd.f32 %v446_v25, %v418_v24 }
  0xeb   :  { %v475_v27 = vpop.f32.mrf.mxu3 }
  0xec   :  { %v476_v28 = vadd.f32 %v475_v27, %v447_v26 }
  0xee   :  { %v481_v29 = vmax.f32 %v476_v28, 0.0 }
  0xf0   :  { %527 = vmatmul.f32.gmra.mxu2 %v481_v29 }
 0x155   :  { %v519_v34 = vpop.f32.mrf.mxu0 }
 0x156   :  { %v520_v35 = vadd.f32 %v622_v33, %v519_v34 }
 0x158   :  { %v531_v36 = vmax.f32 %v520_v35, 0.0 }
 0x15a   :  { %594 = vmatmul.msk.f32.vlgmr.msra.gmra.mxu1 %vm543_vm0, %v531_v36 }
 0x15d   :  { %v522_v37 = vpop.f32.mrf.mxu0 }
 0x15e   :  { %v523_v38 = vadd.f32 %v622_v33, %v522_v37 }
 0x160   :  { %v532_v39 = vmax.f32 %v523_v38, 0.0 }
 0x162   :  { %595 = vmatmul.msk.f32.gmra.mxu1 %vm543_vm0, %v532_v39 }
 0x16b   :  { %v525_v40 = vpop.f32.mrf.mxu2 }
 0x16c   :  { %v526_v41 = vadd.f32 %v622_v33, %v525_v40 }
 0x16e   :  { %v533_v42 = vmax.f32 %v526_v41, 0.0 }
 0x170   :  { %596 = vmatmul.msk.f32.vlgmr.msra.gmra.mxu3 %vm543_vm0, %v533_v42 }
 0x173   :  { %v528_v43 = vpop.f32.mrf.mxu2 }
 0x174   :  { %v529_v44 = vadd.f32 %v622_v33, %v528_v43 }
 0x176   :  { %v534_v45 = vmax.f32 %v529_v44, 0.0 }
 0x178   :  { %597 = vmatmul.msk.f32.gmra.mxu3 %vm543_vm0, %v534_v45 }
 0x1d7   :  { %v573_v47 = vpop.f32.mrf.mxu1 }
 0x1d8   :  { %v574_v50 = vadd.f32 %v623_v46, %v573_v47 }
 0x1da   :  { %585 = vst [vmem:[%s856_s7] sm:$0xff] %v574_v50 }
 0x1df   :  { %v576_v51 = vpop.f32.mrf.mxu1 }
 0x1e0   :  { %v577_v52 = vadd.f32 %v623_v46, %v576_v51 }
 0x1e2   :  { %586 = vst [vmem:[%s856_s7 + $0x8] sm:$0xff] %v577_v52 }
 0x1f3   :  { %v579_v53 = vpop.f32.mrf.mxu3 }
 0x1f4   :  { %v580_v54 = vadd.f32 %v623_v46, %v579_v53 }
 0x1f6   :  { %587 = vst [vmem:[%s856_s7 + $0x10] sm:$0xff] %v580_v54 }
 0x1fb   :  { %v582_v55 = vpop.f32.mrf.mxu3 }
 0x1fc   :  { %v583_v56 = vadd.f32 %v623_v46, %v582_v55 }
 0x1fe   :  { %588 = vst [vmem:[%s856_s7 + $0x18] sm:$0xff] %v583_v56 }
 0x1ff   :  { %593 = vsyncpa [#allocation3], 1 }

</bundles_post_ra>
